<compile_context>
chip_gen: v7x
topology: tpu7x:2x2x1
jax: 0.10.0
libtpu: 0.0.40
codegen_flags: <defaults>
</compile_context>

<pallas_src>
import functools

import jax
import jax.numpy as jnp
from jax import lax
from jax.experimental import pallas as pl
from jax.experimental.pallas import tpu as pltpu


def _round_up(x, m):
    return ((x + m - 1) // m) * m


def _voxelize_kernel(feat_ref, coord_ref, vox_ref, norm_ref,
                     faug_ref, idx_ref, acc_ref,
                     *, r, tv, tn, n_chunks, normalize, eps):
    """Grid = (batch, voxel_tile).

    feat_ref : (1, C, N)        input point features (resident across voxel tiles)
    coord_ref: (1, 3, N)        input point coordinates (resident)
    vox_ref  : (1, C, TV)       averaged voxel features for this voxel tile
    norm_ref : (1, 3, N)        normalized (clamped, scaled) coordinates
    faug_ref : (C+1, Np) f32    scratch: features + ones row, zero-padded points
    idx_ref  : (Np, 1)  i32     scratch: flattened voxel index per point (-1 pad)
    acc_ref  : (C+1, TV) f32    scratch: matmul accumulator across point chunks
    """
    C = feat_ref.shape[1]
    N = feat_ref.shape[2]
    np_pad = faug_ref.shape[1]
    vt = pl.program_id(1)

    # ---- per-batch setup: runs once (voxel-tile axis is inner / "arbitrary").
    @pl.when(vt == 0)
    def _setup():
        c = coord_ref[0].astype(jnp.float32)                       # (3, N)
        mean = jnp.mean(c, axis=1, keepdims=True)                  # (3, 1)
        centered = c - mean
        if normalize:
            # NOTE: like the PyTorch reference, eps=0 with coincident points
            # yields denom=0 (NaNs); semantics kept identical on purpose.
            nrm = jnp.sqrt(jnp.sum(centered * centered, axis=0,
                                   keepdims=True))                 # (1, N)
            denom = jnp.max(nrm) * 2.0 + eps
            norm_c = centered / denom + 0.5
        else:
            norm_c = (centered + 1.0) * 0.5
        norm_c = jnp.clip(norm_c * r, 0.0, float(r - 1))           # (3, N)
        norm_ref[0] = norm_c.astype(norm_ref.dtype)

        v = jnp.round(norm_c).astype(jnp.int32)                    # (3, N)
        idx = v[0:1, :] * (r * r) + v[1:2, :] * r + v[2:3, :]      # (1, N)
        idx_col = jnp.transpose(idx)                               # (N, 1)

        # Augmented feature slab: last row of ones -> counts come out of the
        # same MXU pass (no XLU reduction over the one-hot).
        fa = jnp.concatenate(
            [feat_ref[0].astype(jnp.float32),
             jnp.ones((1, N), jnp.float32)], axis=0)               # (C+1, N)

        if np_pad > N:
            # Padding points: index -1 (matches no voxel column) and zero
            # features (so even a stray match adds nothing, incl. counts).
            idx_col = jnp.concatenate(
                [idx_col, jnp.full((np_pad - N, 1), -1, jnp.int32)], axis=0)
            fa = jnp.concatenate(
                [fa, jnp.zeros((C + 1, np_pad - N), jnp.float32)], axis=1)

        idx_ref[...] = idx_col                                     # (Np, 1)
        faug_ref[...] = fa                                         # (C+1, Np)

    # ---- per-voxel-tile scatter-mean via one-hot matmul on the MXU.
    col0 = vt * tv
    col = lax.broadcasted_iota(jnp.int32, (1, tv), 1) + col0       # (1, TV)

    def partial_sum(start):
        f_chunk = faug_ref[:, pl.ds(start, tn)]                    # (C+1, tn)
        i_chunk = idx_ref[pl.ds(start, tn), :]                     # (tn, 1)
        oh = (i_chunk == col).astype(jnp.float32)                  # (tn, TV)
        return jnp.dot(f_chunk, oh, preferred_element_type=jnp.float32)

    if n_chunks == 1:
        summed = partial_sum(0)                                    # (C+1, TV)
    else:
        acc_ref[...] = partial_sum(0)

        def body(ci, carry):
            start = pl.multiple_of(ci * tn, tn)
            acc_ref[...] += partial_sum(start)
            return carry

        lax.fori_loop(1, n_chunks, body, 0, unroll=(n_chunks <= 8))
        summed = acc_ref[...]

    counts = summed[C:C + 1, :]                                    # (1, TV)
    inv = pl.reciprocal(jnp.maximum(counts, 1.0))                  # empty -> 0
    vox_ref[0] = (summed[0:C, :] * inv).astype(vox_ref.dtype)


def _vmem_budget_bytes(C, N, np_pad, tn, tv):
    f32 = 4
    io = 2 * (C + 3) * N * f32 + 2 * (C * tv + 3 * N) * f32
    # idx scratch occupies one lane out of 128 per row -> ~512 B per row.
    scratch = (C + 1) * np_pad * f32 + np_pad * 512 + (C + 9) * tv * f32
    onehot = 2 * tn * tv * f32
    est = io + scratch + onehot
    return int(min(max(2 * est, 16 * 1024 * 1024), 64 * 1024 * 1024))


def voxelization(features, coords, resolution, normalize=True, eps=0.0,
                 *, voxel_tile=512, point_chunk=2048):
    """features: (B, C, N) f32, coords: (B, 3, N) f32.

    Returns (voxel_grid (B, C, r, r, r), norm_coords (B, 3, N)).
    """
    B, C, N = features.shape
    assert coords.shape == (B, 3, N)
    r = int(resolution)
    r3 = r * r * r

    # Lane-dense voxel tiling: tile width is a multiple of 128 and the padded
    # voxel axis is a multiple of the tile width.  Padding columns receive no
    # points -> zero output; sliced off in the wrapper.
    tv = _round_up(min(int(voxel_tile), _round_up(r3, 128)), 128)
    voxp = _round_up(r3, tv)
    n_vt = voxp // tv

    # Point chunking bounds the (tn, TV) one-hot intermediate in VMEM.
    tn = min(_round_up(int(point_chunk), 128), _round_up(N, 128))
    np_pad = _round_up(N, tn)
    n_chunks = np_pad // tn

    kernel = functools.partial(_voxelize_kernel, r=r, tv=tv, tn=tn,
                               n_chunks=n_chunks, normalize=normalize,
                               eps=float(eps))

    vox_pad, norm_coords = pl.pallas_call(
        kernel,
        out_shape=(
            jax.ShapeDtypeStruct((B, C, voxp), jnp.float32),
            jax.ShapeDtypeStruct((B, 3, N), jnp.float32),
        ),
        grid_spec=pltpu.PrefetchScalarGridSpec(
            num_scalar_prefetch=0,
            grid=(B, n_vt),
            in_specs=[
                # Constant block index along the voxel-tile axis -> inputs
                # stay resident in VMEM across voxel tiles of one batch.
                pl.BlockSpec((1, C, N), lambda b, v: (b, 0, 0)),
                pl.BlockSpec((1, 3, N), lambda b, v: (b, 0, 0)),
            ],
            out_specs=[
                pl.BlockSpec((1, C, tv), lambda b, v: (b, 0, v)),
                pl.BlockSpec((1, 3, N), lambda b, v: (b, 0, 0)),
            ],
            scratch_shapes=[
                pltpu.VMEM((C + 1, np_pad), jnp.float32),  # augmented features
                pltpu.VMEM((np_pad, 1), jnp.int32),        # voxel index column
                pltpu.VMEM((C + 1, tv), jnp.float32),      # chunk accumulator
            ],
        ),
        compiler_params=pltpu.CompilerParams(
            dimension_semantics=("parallel", "arbitrary"),
            vmem_limit_bytes=_vmem_budget_bytes(C, N, np_pad, tn, tv),
        ),
    )(features, coords)

    vox = vox_pad[:, :, :r3].reshape(B, C, r, r, r)
    return vox, norm_coords


def _reference(features, coords, resolution, normalize=True, eps=0.0):
    """Pure-JAX reference reproducing the PyTorch semantics."""
    B, C, N = features.shape
    r = int(resolution)
    mean = jnp.mean(coords, axis=2, keepdims=True)
    centered = coords - mean
    if normalize:
        nrm = jnp.linalg.norm(centered, axis=1, keepdims=True)       # (B,1,N)
        denom = jnp.max(nrm, axis=2, keepdims=True) * 2.0 + eps      # (B,1,1)
        norm_c = centered / denom + 0.5
    else:
        norm_c = (centered + 1.0) / 2.0
    norm_c = jnp.clip(norm_c * r, 0.0, r - 1.0)
    v = jnp.round(norm_c).astype(jnp.int32)
    idx = v[:, 0, :] * r * r + v[:, 1, :] * r + v[:, 2, :]           # (B,N)
    oh = jax.nn.one_hot(idx, r * r * r, dtype=jnp.float32)           # (B,N,r^3)
    summed = jnp.einsum("bcn,bnv->bcv", features, oh)
    counts = jnp.sum(oh, axis=1)[:, None, :]                         # (B,1,r^3)
    avg = summed / jnp.maximum(counts, 1.0)
    return avg.reshape(B, C, r, r, r), norm_c


if __name__ == "__main__":
    key = jax.random.PRNGKey(0)

    # (B, C, N, resolution, normalize, point_chunk)
    configs = [
        (2, 4, 128, 4, True, 2048),   # single point chunk, single voxel tile
        (1, 4, 200, 8, True, 128),    # multi point-chunk path + ragged padding
        (2, 4, 128, 16, False, 2048), # multiple voxel tiles, normalize=False
    ]

    for i, (B, C, N, r, norm, pchunk) in enumerate(configs):
        kf, kc, key = jax.random.split(key, 3)
        features = jax.random.normal(kf, (B, C, N), dtype=jnp.float32)
        coords = jax.random.normal(kc, (B, 3, N), dtype=jnp.float32)

        vox, norm_coords = voxelization(features, coords, r, normalize=norm,
                                        eps=0.0, point_chunk=pchunk)
        jax.block_until_ready(vox)
        jax.block_until_ready(norm_coords)

        vox_ref, norm_ref = _reference(features, coords, r, normalize=norm,
                                       eps=0.0)

        assert vox.shape == (B, C, r, r, r), f"cfg {i}: bad vox shape"
        assert norm_coords.shape == (B, 3, N), f"cfg {i}: bad coords shape"
        assert jnp.allclose(vox, vox_ref, atol=1e-5, rtol=1e-5), \
            f"cfg {i}: voxel grid mismatch"
        assert jnp.allclose(norm_coords, norm_ref, atol=1e-5, rtol=1e-5), \
            f"cfg {i}: norm coords mismatch"

    print("KERNEL_OK")
</pallas_src>

<mosaic_0001>
module attributes {stable_mosaic.version = 11 : i64} {
  func.func @_voxelize_kernel(%arg0: i32, %arg1: i32, %arg2: memref<1x4x128xf32, #tpu.memory_space<vmem>>, %arg3: memref<1x3x128xf32, #tpu.memory_space<vmem>>, %arg4: memref<1x4x128xf32, #tpu.memory_space<vmem>>, %arg5: memref<1x3x128xf32, #tpu.memory_space<vmem>>, %arg6: memref<5x128xf32, #tpu.memory_space<vmem>>, %arg7: memref<128x1xi32, #tpu.memory_space<vmem>>, %arg8: memref<5x128xf32, #tpu.memory_space<vmem>>) attributes {dimension_semantics = [#tpu.dimension_semantics<parallel>, #tpu.dimension_semantics<arbitrary>], iteration_bounds = array<i64: 2, 1>, scalar_prefetch = 0 : i64, scratch_operands = 3 : i64, tpu.core_type = #tpu.core_type<tc>, window_params = [{transform_indices = @transform_0, window_bounds = array<i64: 1, 4, 128>}, {transform_indices = @transform_1, window_bounds = array<i64: 1, 3, 128>}, {transform_indices = @transform_2, window_bounds = array<i64: 1, 4, 128>}, {transform_indices = @transform_3, window_bounds = array<i64: 1, 3, 128>}]} {
    %c0_i32 = arith.constant 0 : i32
    %0 = arith.cmpi eq, %arg1, %c0_i32 : i32
    %1 = arith.extui %0 : i1 to i32
    %c0_i32_0 = arith.constant 0 : i32
    %2 = arith.cmpi ne, %1, %c0_i32_0 : i32
    scf.if %2 {
      %c0_8 = arith.constant 0 : index
      %c0_9 = arith.constant 0 : index
      %c0_10 = arith.constant 0 : index
      %25 = vector.load %arg3[%c0_8, %c0_9, %c0_10] : memref<1x3x128xf32, #tpu.memory_space<vmem>>, vector<1x3x128xf32>
      %26 = vector.shape_cast %25 : vector<1x3x128xf32> to vector<3x128xf32>
      %cst_11 = arith.constant dense<0.000000e+00> : vector<3xf32>
      %27 = vector.multi_reduction <add>, %26, %cst_11 [1] : vector<3x128xf32> to vector<3xf32>
      %28 = vector.shape_cast %27 : vector<3xf32> to vector<3x1xf32>
      %cst_12 = arith.constant 1.280000e+02 : f32
      %29 = vector.broadcast %cst_12 : f32 to vector<3x1xf32>
      %30 = arith.divf %28, %29 : vector<3x1xf32>
      %31 = vector.broadcast %30 : vector<3x1xf32> to vector<3x128xf32>
      %32 = arith.subf %26, %31 : vector<3x128xf32>
      %33 = arith.mulf %32, %32 : vector<3x128xf32>
      %cst_13 = arith.constant dense<0.000000e+00> : vector<128xf32>
      %34 = vector.multi_reduction <add>, %33, %cst_13 [0] : vector<3x128xf32> to vector<128xf32>
      %35 = vector.shape_cast %34 : vector<128xf32> to vector<1x128xf32>
      %36 = math.sqrt %35 : vector<1x128xf32>
      %37 = vector.shape_cast %36 : vector<1x128xf32> to vector<1x1x128xf32>
      %cst_14 = arith.constant dense<0xFF800000> : vector<1xf32>
      %38 = vector.multi_reduction <maximumf>, %37, %cst_14 [1, 2] : vector<1x1x128xf32> to vector<1xf32>
      %39 = vector.shape_cast %38 : vector<1xf32> to vector<1x1x1xf32>
      %40 = vector.extract %39[0, 0, 0] : f32 from vector<1x1x1xf32>
      %cst_15 = arith.constant 2.000000e+00 : f32
      %41 = arith.mulf %40, %cst_15 : f32
      %cst_16 = arith.constant 0.000000e+00 : f32
      %42 = arith.addf %41, %cst_16 : f32
      %43 = vector.broadcast %42 : f32 to vector<3x128xf32>
      %44 = arith.divf %32, %43 : vector<3x128xf32>
      %cst_17 = arith.constant 5.000000e-01 : f32
      %45 = vector.broadcast %cst_17 : f32 to vector<3x128xf32>
      %46 = arith.addf %44, %45 : vector<3x128xf32>
      %cst_18 = arith.constant 4.000000e+00 : f32
      %47 = vector.broadcast %cst_18 : f32 to vector<3x128xf32>
      %48 = arith.mulf %46, %47 : vector<3x128xf32>
      %cst_19 = arith.constant 0.000000e+00 : f32
      %cst_20 = arith.constant 3.000000e+00 : f32
      %49 = vector.broadcast %cst_19 : f32 to vector<3x128xf32>
      %50 = arith.maximumf %49, %48 : vector<3x128xf32>
      %51 = vector.broadcast %cst_20 : f32 to vector<3x128xf32>
      %52 = arith.minimumf %51, %50 : vector<3x128xf32>
      %c0_21 = arith.constant 0 : index
      %c0_22 = arith.constant 0 : index
      %c0_23 = arith.constant 0 : index
      %53 = vector.load %arg5[%c0_21, %c0_22, %c0_23] : memref<1x3x128xf32, #tpu.memory_space<vmem>>, vector<1x3x128xf32>
      %54 = vector.shape_cast %53 : vector<1x3x128xf32> to vector<3x128xf32>
      %55 = vector.shape_cast %52 : vector<3x128xf32> to vector<1x3x128xf32>
      tpu.vector_store %arg5[%c0_21, %c0_22, %c0_23], %55 {strides = array<i32>} : memref<1x3x128xf32, #tpu.memory_space<vmem>>, vector<1x3x128xf32>,
      %56 = math.roundeven %52 : vector<3x128xf32>
      %57 = arith.fptosi %56 : vector<3x128xf32> to vector<3x128xi32>
      %58 = vector.extract_strided_slice %57 {offsets = [0, 0], sizes = [1, 128], strides = [1, 1]} : vector<3x128xi32> to vector<1x128xi32>
      %c16_i32 = arith.constant 16 : i32
      %59 = vector.broadcast %c16_i32 : i32 to vector<1x128xi32>
      %60 = arith.muli %58, %59 : vector<1x128xi32>
      %61 = vector.extract_strided_slice %57 {offsets = [1, 0], sizes = [1, 128], strides = [1, 1]} : vector<3x128xi32> to vector<1x128xi32>
      %c4_i32 = arith.constant 4 : i32
      %62 = vector.broadcast %c4_i32 : i32 to vector<1x128xi32>
      %63 = arith.muli %61, %62 : vector<1x128xi32>
      %64 = arith.addi %60, %63 : vector<1x128xi32>
      %65 = vector.extract_strided_slice %57 {offsets = [2, 0], sizes = [1, 128], strides = [1, 1]} : vector<3x128xi32> to vector<1x128xi32>
      %66 = arith.addi %64, %65 : vector<1x128xi32>
      %67 = tpu.transpose %66, [1, 0] : vector<1x128xi32> -> vector<128x1xi32>
      %c0_24 = arith.constant 0 : index
      %c0_25 = arith.constant 0 : index
      %c0_26 = arith.constant 0 : index
      %68 = vector.load %arg2[%c0_24, %c0_25, %c0_26] : memref<1x4x128xf32, #tpu.memory_space<vmem>>, vector<1x4x128xf32>
      %69 = vector.shape_cast %68 : vector<1x4x128xf32> to vector<4x128xf32>
      %cst_27 = arith.constant 1.000000e+00 : f32
      %70 = vector.broadcast %cst_27 : f32 to vector<1x128xf32>
      %71 = tpu.concatenate %69, %70 in 0 : vector<4x128xf32>, vector<1x128xf32> -> vector<5x128xf32>
      %c0_28 = arith.constant 0 : index
      %c0_29 = arith.constant 0 : index
      %72 = vector.load %arg7[%c0_28, %c0_29] : memref<128x1xi32, #tpu.memory_space<vmem>>, vector<128x1xi32>
      tpu.vector_store %arg7[%c0_28, %c0_29], %67 {strides = array<i32>} : memref<128x1xi32, #tpu.memory_space<vmem>>, vector<128x1xi32>,
      %c0_30 = arith.constant 0 : index
      %c0_31 = arith.constant 0 : index
      %73 = vector.load %arg6[%c0_30, %c0_31] : memref<5x128xf32, #tpu.memory_space<vmem>>, vector<5x128xf32>
      tpu.vector_store %arg6[%c0_30, %c0_31], %71 {strides = array<i32>} : memref<5x128xf32, #tpu.memory_space<vmem>>, vector<5x128xf32>,
    } else {
    }
    %c128_i32 = arith.constant 128 : i32
    %3 = arith.muli %arg1, %c128_i32 : i32
    %4 = tpu.iota {dimensions = array<i32: 1>} : vector<1x128xi32>
    %5 = vector.broadcast %3 : i32 to vector<1x128xi32>
    %6 = arith.addi %4, %5 : vector<1x128xi32>
    %c0 = arith.constant 0 : index
    %c0_1 = arith.constant 0 : index
    %7 = vector.load %arg6[%c0, %c0_1] : memref<5x128xf32, #tpu.memory_space<vmem>>, vector<5x128xf32>
    %c0_2 = arith.constant 0 : index
    %c0_3 = arith.constant 0 : index
    %8 = vector.load %arg7[%c0_2, %c0_3] : memref<128x1xi32, #tpu.memory_space<vmem>>, vector<128x1xi32>
    %9 = vector.broadcast %8 : vector<128x1xi32> to vector<128x128xi32>
    %10 = vector.broadcast %6 : vector<1x128xi32> to vector<128x128xi32>
    %11 = arith.cmpi eq, %9, %10 : vector<128x128xi32>
    %12 = arith.extui %11 : vector<128x128xi1> to vector<128x128xi32>
    %13 = arith.sitofp %12 : vector<128x128xi32> to vector<128x128xf32>
    %cst = arith.constant dense<0.000000e+00> : vector<5x128xf32>
    %14 = tpu.matmul %7, %13, %cst {dimension_numbers = #tpu.dot_dimension_numbers<[1], [0], [0], [1], [0, 0, 1, 1], [], []>} : vector<5x128xf32>, vector<128x128xf32>, vector<5x128xf32> -> vector<5x128xf32>
    %15 = vector.extract_strided_slice %14 {offsets = [4, 0], sizes = [1, 128], strides = [1, 1]} : vector<5x128xf32> to vector<1x128xf32>
    %cst_4 = arith.constant 1.000000e+00 : f32
    %16 = vector.broadcast %cst_4 : f32 to vector<1x128xf32>
    %17 = arith.maximumf %15, %16 : vector<1x128xf32>
    %18 = tpu.reciprocal %17 : vector<1x128xf32> -> vector<1x128xf32>
    %19 = vector.extract_strided_slice %14 {offsets = [0, 0], sizes = [4, 128], strides = [1, 1]} : vector<5x128xf32> to vector<4x128xf32>
    %20 = vector.broadcast %18 : vector<1x128xf32> to vector<4x128xf32>
    %21 = arith.mulf %19, %20 : vector<4x128xf32>
    %c0_5 = arith.constant 0 : index
    %c0_6 = arith.constant 0 : index
    %c0_7 = arith.constant 0 : index
    %22 = vector.load %arg4[%c0_5, %c0_6, %c0_7] : memref<1x4x128xf32, #tpu.memory_space<vmem>>, vector<1x4x128xf32>
    %23 = vector.shape_cast %22 : vector<1x4x128xf32> to vector<4x128xf32>
    %24 = vector.shape_cast %21 : vector<4x128xf32> to vector<1x4x128xf32>
    tpu.vector_store %arg4[%c0_5, %c0_6, %c0_7], %24 {strides = array<i32>} : memref<1x4x128xf32, #tpu.memory_space<vmem>>, vector<1x4x128xf32>,
    return
  }
  func.func @transform_0(%arg0: i32, %arg1: i32) -> (i32, i32, i32) {
    %c0_i32 = arith.constant 0 : i32
    %c0_i32_0 = arith.constant 0 : i32
    %c0_i32_1 = arith.constant 0 : i32
    return %arg0, %c0_i32, %c0_i32_0 : i32, i32, i32
  }
  func.func @transform_1(%arg0: i32, %arg1: i32) -> (i32, i32, i32) {
    %c0_i32 = arith.constant 0 : i32
    %c0_i32_0 = arith.constant 0 : i32
    %c0_i32_1 = arith.constant 0 : i32
    return %arg0, %c0_i32, %c0_i32_0 : i32, i32, i32
  }
  func.func @transform_2(%arg0: i32, %arg1: i32) -> (i32, i32, i32) {
    %c0_i32 = arith.constant 0 : i32
    %c0_i32_0 = arith.constant 0 : i32
    return %arg0, %c0_i32, %arg1 : i32, i32, i32
  }
  func.func @transform_3(%arg0: i32, %arg1: i32) -> (i32, i32, i32) {
    %c0_i32 = arith.constant 0 : i32
    %c0_i32_0 = arith.constant 0 : i32
    %c0_i32_1 = arith.constant 0 : i32
    return %arg0, %c0_i32, %c0_i32_0 : i32, i32, i32
  }
}

</mosaic_0001>

<bundles_post_ra>
// kernel: tpu_custom_call.1
= control target key start
LH: loop header
LB: loop body
LE: loop exit
PB: predicated region body
PF: predicated region fallthrough
CT: control target
= control target key end

     0   :  { %9 = vsyncpa [#allocation6], 0  ;;  %s1079_s0 = inlined_call_operand.vmem [shape: f32[2,4,128], index: 0, kind: input, shape index: {}]   ;;  %s1080_s1 = inlined_call_operand.vmem [shape: f32[2,3,128], index: 1, kind: input, shape index: {}]   ;;  %s1081_s2 = inlined_call_operand.hbm [shape: f32[2,4,128], index: 2, kind: output, shape index: {0}]   ;;  %s1082_s3 = inlined_call_operand.vmem [shape: f32[2,3,128], index: 3, kind: output, shape index: {1}]  }
   0x1   :  { %11 = vsyncpa [#allocation6 + $0x1], 0  ;;  %s930_s12 = smov 0   ;;  %s932_s13 = smov 0  }
   0x2   :  { %s934_s14 = smov 0   ;;  %s936_s15 = smov 0  }
   0x3   :  { %s938_s16 = smov 0   ;;  %s940_s17 = smov 0  }
   0x4 LB: > { %s630_s18 = sadd.s32 4294967295, %s902_s17   ;;  %s631_s19 = sadd.s32 4294967294, %s902_s17   ;;  %s902_s17 = sphi %s940_s17, %s17_s17   ;;  %s898_s16 = sphi %s938_s16, %s1089_s16   ;;  %s894_s15 = sphi %s936_s15, %s1088_s15   ;;  %s890_s14 = sphi %s934_s14, %s1087_s14   ;;  %s886_s13 = sphi %s932_s13, %s1086_s13   ;;  %s882_s12 = sphi %s930_s12, %s1085_s12  }
   0x5   : > { %s29_s20 = sadd.s32 1, %s898_s16  ;;  %s90_s21 = sadd.s32 1, %s890_s14 }
   0x6   : > { %p31_p0 = scmp.ge.s32.totalorder %s29_s20, 2  ;;  %p100_p1 = scmp.ne.s32.totalorder %s890_s14, %s886_s13 }
   0x7   : > { %p101_p2 = scmp.eq.s32.totalorder %s630_s18, 1  ;;  %p106_p3 = scmp.ne.s32.totalorder %s886_s13, %s882_s12 }
   0x8   : > { %s1091_s20 = smov (%p31_p0, %s29_s20), 0  ;;  %p107_p5 = scmp.eq.s32.totalorder %s631_s19, 1 }
   0x9   : > { %p970_p4 = por %p101_p2, %p100_p1  ;;  %s85_s23 = ssub.s32 %s898_s16, %s1091_s20 }
   0xa   : > { %p634_p6 = scmp.ge.s32.totalorder %s902_s17, 1  ;;  %p88_p7 = scmp.eq.s32.totalorder %s85_s23, 0 }
   0xb   : > { %p977_p8 = por %p107_p5, %p106_p3  ;;  %p165_p9 = scmp.lt.s32.totalorder %s902_s17, 3 }
   0xc   : > { %s983_s25 = scalar_select %p88_p7, %s890_s14, %s90_s21  }
   0xd   : > { %p166_p10 = pnand %p634_p6, %p165_p9 }
   0xe   : > { %p196_p11 = scmp.lt.s32.totalorder (!%p166_p10), %s894_s15, 1  ;;  %vm213_vm0 = vcmask (!%p166_p10), 1042432   ;;  %vm288_vm1 = vcmask (!%p166_p10), 1043456   ;;  %v904_v35 = vmov (!%p166_p10), 0   ;;  %vm290_vm4 = vcmask (!%p166_p10), 7168   ;;  %s187_s18 = sand.u32 (!%p166_p10), 1, %s886_s13  }
   0xf   : > { %169 = sbr.rel (%p166_p10) target bundleno = 1003 (0x3eb), region = 28  ;;  %817 = vset.pattern.permute.xlu0 (!%p166_p10), %v904_v35  ;;  %v905_v42 = vmov (!%p166_p10), 0.0|0.0   ;;  %vm906_vm5 = vmmov (!%p166_p10), 0   ;;  %s635_s19 = sshll.u32 (!%p166_p10), %s187_s18, 2 }
  0x10   : > { %727 = vmatprep.subr.bf16.mxu0 (!%p166_p10), %v905_v42  ;;  %s672_s21 = sshll.u32 (!%p166_p10), %s894_s15, 6  ;;  %s189_s23 = scalar_lea.vmem (!%p166_p10), [#allocation5], %s635_s19 }
  0x11   : > { %s1032_s29 = scalar_lea.hbm (!%p166_p10), %s1081_s2, %s672_s21 }
  0x16   : > { %s197_s26 = scalar_select %p196_p11, %s894_s15, 1 }
  0x17   : > { %s909_s15 = smov [#allocation5]  }
  0x18   : > { %s987_s27 = sshll.u32 %s197_s26, 2  ;;  %s523_s26 = sshll.u32 %s189_s23, 4  ;;  %s1034_s26 = int_to_ptr.vmem [resolvable:$true] %s523_s26 }
  0x19   : > { %s203_s30 = scalar_lea.vmem %s1080_s1, %s987_s27  ;;  %s199_s6 = scalar_lea.vmem %s1079_s0, %s987_s27 }
  0x1a   : > { %v212_v0 = vld [vmem:[%s203_s30] sm:$0x7]  ;;  %s207_s11 = scalar_lea.vmem %s1082_s3, %s987_s27  ;;  %s505_s30 = scalar_lea.sflag [#allocation6], %s187_s18 }
  0x1b   : > { %v214_v1 = vsel %vm213_vm0, %v212_v0, 0.0  ;;  %v287_v2 = vld [vmem:[%s199_s6] sm:$0xf]  ;;  %s824_s4 = scalar_lea.vmem %s1034_s26, 64  ;;  %s828_s5 = sshll.u32 %s909_s15, 4  ;;  %s829_s5 = int_to_ptr.vmem [resolvable:$false] %s828_s5 }
  0x1c   : > { %215 = vadd.xlane.f32.xlu0 %v214_v1  ;;  %v289_v3 = vsel %vm288_vm1, %v287_v2, 1.0  ;;  %p825_p12 = scmp.ne.s32.totalorder %s1034_s26, %s824_s4  ;;  %s830_s6 = scalar_lea.vmem %s829_s5, 128 }
  0x1d   : > { %307 = vst [vmem:[#allocation2] sm:$0x1f] %v289_v3  ;;  %p831_p1 = scmp.lt.s32.totalorder %s1034_s26, %s829_s5  ;;  %p832_p2 = scmp.lt.s32.totalorder %s830_s6, %s824_s4 }
  0x1e   : > { %p826_p13 = pnand %p825_p12, %p970_p4 }
  0x1f   : > { %p833_p3 = por %p832_p2, %p831_p1 }
  0x20   : > { %p827_p0 = pneg %p826_p13 }
  0x22   : > { %p834_p5 = pnand %p833_p3, %p827_p0 }
  0xa9   : > { %v216_v4 = vpop.xlane.xlu0 %215 }
  0xaa   : > { %v218_v5 = vmul.f32 0.0078125, %v216_v4 }
  0xac   : > { %v219_v6 = vsub.f32 %v212_v0, %v218_v5  ;;  %v907_v5 = vmov 0.0  }
  0xad   : > { %724 = vmatprep.mubr.msk.f32.mxu0 %vm906_vm5, %v907_v5 }
  0xae   : > { %v220_v7 = vmul.f32 %v219_v6, %v219_v6 }
  0xb0   : > { %v221_v8 = vsel %vm213_vm0, %v220_v7, 0.0 }
  0xb1   : > { %v222_v9 = vrot.slane %v221_v8, 4 }
  0xb3   : > { %v223_v10 = vadd.f32 %v222_v9, %v221_v8 }
  0xb5   : > { %v224_v11 = vrot.slane %v223_v10, 2 }
  0xb7   : > { %v225_v12 = vadd.f32 %v224_v11, %v223_v10  ;;  %v908_v10 = vmov 1.0|1.0  }
  0xb9   : > { %v226_v13 = vrot.slane %v225_v12, 1 }
  0xbb   : > { %v227_v14 = vadd.f32 %v226_v13, %v225_v12 }
  0xbd   : > { %818 = vrsqrt.f32 %v227_v14  ;;  %vm230_vm2 = vcmp.eq.f32.partialorder %v227_v14, inf  ;;  %v233_v17 = vand.u32 2147483648, %v227_v14  ;;  %vm232_vm3 = vcmp.eq.f32.partialorder %v227_v14, 0.0 }
  0xc7   : > { %v819_v15 = vpop.eup %818 }
  0xc8   : > { %v229_v16 = vmul.f32 %v819_v15, %v227_v14 }
  0xca   : > { %v231_v18 = vsel %vm230_vm2, %v227_v14, %v229_v16 }
  0xcb   : > { %v234_v19 = vsel %vm232_vm3, %v233_v17, %v231_v18 }
  0xcc   : > { %235 = vmax.xlane.f32.xlu0 %v234_v19 }
 0x159   : > { %v236_v20 = vpop.xlane.xlu0 %235 }
 0x15a   : > { %751 = vpush %v236_v20 }
 0x18b   : > { %s752_s7 = spop %751 }
 0x18c   : > { %s238_s8 = smul.f32 2.0, %s752_s7 }
 0x18e   : > { %v240_v21 = vstv %s238_s8 }
 0x18f   : > { %820 = vrcp.f32 %v240_v21 }
 0x199   : > { %v821_v22 = vpop.eup %820 }
 0x19a   : > { %v242_v23 = vmul.f32 %v821_v22, %v219_v6  ;;  %v309_v6 = vlaneseq }
 0x19c   : > { %v243_v24 = vadd.f32 0.5, %v242_v23  ;;  %v310_v7 = vand.u32 127, %v309_v6 }
 0x19e   : > { %v244_v25 = vmul.f32 4.0, %v243_v24 }
 0x1a0   : > { %v245_v26 = vmax.f32 %v244_v25, 0.0  ;;  %v313_v25 = vld [vmem:[#allocation2] sm:$0x1f] }
 0x1a2   : > { %v246_v27 = vmin.f32 %v245_v26, 3.0 }
 0x1a4   : > { %v755_v28 = vcvt.f32.s32 %v246_v27  ;;  %247 = vst [vmem:[%s207_s11] sm:$0x7] %v246_v27 }
 0x1a6   : > { %v250_v29 = vmul.u32 4, %v755_v28  ;;  %v249_v30 = vmul.u32 16, %v755_v28  ;;  %v253_v33 = vrot.slane %v755_v28, 2 }
 0x1a8   : > { %v251_v31 = vrot.slane %v250_v29, 1  ;;  %v499_v29 = vshrl.u32 %v309_v6, 7 }
 0x1aa   : > { %v252_v32 = vadd.s32 %v251_v31, %v249_v30  ;;  %v500_v30 = vsub.s32 4, %v499_v29 }
 0x1ac   : > { %v254_v34 = vadd.s32 %v253_v33, %v252_v32 }
 0x1ae   : > { %255 = vxpose.xlu1.b32.start.end [1/1] (short) %v254_v34, 128 }
 0x1cc   : > { %816 = vset.pattern.permute.xlu1 %v904_v35 }
 0x22e   : > { %v271_v36 = vpop.trf.xlu1 }
 0x22f   : > { %291 = vst.msk [vmem:[#allocation3] sm:$0xff] %vm290_vm4, %v271_v36 }
 0x232   : > { %v272_v37 = vpop.trf.xlu1 }
 0x233   : > { %292 = vst.msk [vmem:[#allocation3 + $0x8] sm:$0xff] %vm290_vm4, %v272_v37 }
 0x236   : > { %v273_v38 = vpop.trf.xlu1  ;;  %v314_v39 = vld [vmem:[#allocation3] sm:$0xff] }
 0x237   : > { %293 = vst.msk [vmem:[#allocation3 + $0x10] sm:$0xff] %vm290_vm4, %v273_v38  ;;  %331 = vperm.xlu1 %816, %v314_v39  }
 0x23a   : > { %v274_v40 = vpop.trf.xlu1  ;;  %v315_v41 = vld [vmem:[#allocation3 + $0x8] sm:$0xff] }
 0x23b   : > { %294 = vst.msk [vmem:[#allocation3 + $0x18] sm:$0xff] %vm290_vm4, %v274_v40  ;;  %334 = vperm.xlu0 %817, %v315_v41  }
 0x23e   : > { %v275_v43 = vpop.trf.xlu1  ;;  %v316_v44 = vld [vmem:[#allocation3 + $0x10] sm:$0xff] }
 0x23f   : > { %295 = vst.msk [vmem:[#allocation3 + $0x20] sm:$0xff] %vm290_vm4, %v275_v43  ;;  %337 = vperm.xlu0 %817, %v316_v44  }
 0x242   : > { %v276_v45 = vpop.trf.xlu1  ;;  %v317_v46 = vld [vmem:[#allocation3 + $0x18] sm:$0xff] }
 0x243   : > { %296 = vst.msk [vmem:[#allocation3 + $0x28] sm:$0xff] %vm290_vm4, %v276_v45  ;;  %340 = vperm.xlu0 %817, %v317_v46  }
 0x246   : > { %v277_v47 = vpop.trf.xlu1  ;;  %v318_v48 = vld [vmem:[#allocation3 + $0x20] sm:$0xff] }
 0x247   : > { %297 = vst.msk [vmem:[#allocation3 + $0x30] sm:$0xff] %vm290_vm4, %v277_v47  ;;  %343 = vperm.xlu0 %817, %v318_v48  }
 0x24a   : > { %v278_v49 = vpop.trf.xlu1  ;;  %v319_v50 = vld [vmem:[#allocation3 + $0x28] sm:$0xff] }
 0x24b   : > { %298 = vst.msk [vmem:[#allocation3 + $0x38] sm:$0xff] %vm290_vm4, %v278_v49  ;;  %346 = vperm.xlu0 %817, %v319_v50  }
 0x24e   : > { %v279_v51 = vpop.trf.xlu1  ;;  %v320_v52 = vld [vmem:[#allocation3 + $0x30] sm:$0xff] }
 0x24f   : > { %299 = vst.msk [vmem:[#allocation3 + $0x40] sm:$0xff] %vm290_vm4, %v279_v51  ;;  %349 = vperm.xlu0 %817, %v320_v52  }
 0x252   : > { %v280_v53 = vpop.trf.xlu1  ;;  %v321_v54 = vld [vmem:[#allocation3 + $0x38] sm:$0xff] }
 0x253   : > { %300 = vst.msk [vmem:[#allocation3 + $0x48] sm:$0xff] %vm290_vm4, %v280_v53  ;;  %352 = vperm.xlu0 %817, %v321_v54  }
 0x256   : > { %v281_v55 = vpop.trf.xlu1  ;;  %v322_v56 = vld [vmem:[#allocation3 + $0x40] sm:$0xff] }
 0x257   : > { %301 = vst.msk [vmem:[#allocation3 + $0x50] sm:$0xff] %vm290_vm4, %v281_v55  ;;  %355 = vperm.xlu0 %817, %v322_v56  }
 0x25a   : > { %v282_v57 = vpop.trf.xlu1  ;;  %v323_v58 = vld [vmem:[#allocation3 + $0x48] sm:$0xff] }
 0x25b   : > { %302 = vst.msk [vmem:[#allocation3 + $0x58] sm:$0xff] %vm290_vm4, %v282_v57  ;;  %358 = vperm.xlu0 %817, %v323_v58  }
 0x25e   : > { %v283_v59 = vpop.trf.xlu1  ;;  %v324_v60 = vld [vmem:[#allocation3 + $0x50] sm:$0xff] }
 0x25f   : > { %303 = vst.msk [vmem:[#allocation3 + $0x60] sm:$0xff] %vm290_vm4, %v283_v59  ;;  %361 = vperm.xlu0 %817, %v324_v60  }
 0x262   : > { %v284_v61 = vpop.trf.xlu1  ;;  %v325_v62 = vld [vmem:[#allocation3 + $0x58] sm:$0xff] }
 0x263   : > { %304 = vst.msk [vmem:[#allocation3 + $0x68] sm:$0xff] %vm290_vm4, %v284_v61  ;;  %364 = vperm.xlu0 %817, %v325_v62  }
 0x266   : > { %v285_v63 = vpop.trf.xlu1  ;;  %v326_v0 = vld [vmem:[#allocation3 + $0x60] sm:$0xff] }
 0x267   : > { %305 = vst.msk [vmem:[#allocation3 + $0x70] sm:$0xff] %vm290_vm4, %v285_v63  ;;  %367 = vperm.xlu0 %817, %v326_v0  }
 0x26a   : > { %v286_v1 = vpop.trf.xlu1  ;;  %v327_v2 = vld [vmem:[#allocation3 + $0x68] sm:$0xff] }
 0x26b   : > { %306 = vst.msk [vmem:[#allocation3 + $0x78] sm:$0xff] %vm290_vm4, %v286_v1  ;;  %370 = vperm.xlu1 %816, %v327_v2  }
 0x26e   : > { %v328_v3 = vld [vmem:[#allocation3 + $0x70] sm:$0xff] }
 0x26f   : > { %373 = vperm.xlu0 %817, %v328_v3  }
 0x272   : > { %v329_v4 = vld [vmem:[#allocation3 + $0x78] sm:$0xff] }
 0x273   : > { %376 = vperm.xlu1 %816, %v329_v4  }
 0x2b6   : > { %v332_v8 = vpop.permute.xlu1 %331 }
 0x2b7   : > { %vm378_vm6 = vcmp.eq.s32.totalorder %v332_v8, %v310_v7 }
 0x2ba   : > { %v335_v9 = vpop.permute.xlu0 %334 }
 0x2bb   : > { %vm379_vm7 = vcmp.eq.s32.totalorder %v335_v9, %v310_v7 }
 0x2bc   : > { %vm728_vm8 = vmpackc.low %vm379_vm7, %vm378_vm6 }
 0x2bd   : > { %729 = vmatpush3.bf16.msk.msra.mxu0 %vm728_vm8, %v908_v10 }
 0x2be   : > { %v338_v11 = vpop.permute.xlu0 %337  ;;  %730 = vmatprep.subr.bf16.mxu0 %v905_v42 }
 0x2bf   : > { %vm380_vm9 = vcmp.eq.s32.totalorder %v338_v11, %v310_v7 }
 0x2c2   : > { %v341_v12 = vpop.permute.xlu0 %340 }
 0x2c3   : > { %vm381_vm10 = vcmp.eq.s32.totalorder %v341_v12, %v310_v7 }
 0x2c4   : > { %vm731_vm11 = vmpackc.low %vm381_vm10, %vm380_vm9 }
 0x2c5   : > { %732 = vmatpush3.bf16.msk.msra.mxu0 %vm731_vm11, %v908_v10 }
 0x2c6   : > { %v344_v13 = vpop.permute.xlu0 %343  ;;  %733 = vmatprep.subr.bf16.mxu0 %v905_v42 }
 0x2c7   : > { %vm382_vm12 = vcmp.eq.s32.totalorder %v344_v13, %v310_v7 }
 0x2ca   : > { %v347_v14 = vpop.permute.xlu0 %346 }
 0x2cb   : > { %vm383_vm13 = vcmp.eq.s32.totalorder %v347_v14, %v310_v7 }
 0x2cc   : > { %vm734_vm14 = vmpackc.low %vm383_vm13, %vm382_vm12 }
 0x2cd   : > { %735 = vmatpush3.bf16.msk.msra.mxu0 %vm734_vm14, %v908_v10 }
 0x2ce   : > { %v350_v15 = vpop.permute.xlu0 %349  ;;  %736 = vmatprep.subr.bf16.mxu0 %v905_v42 }
 0x2cf   : > { %vm384_vm15 = vcmp.eq.s32.totalorder %v350_v15, %v310_v7 }
 0x2d2   : > { %v353_v16 = vpop.permute.xlu0 %352 }
 0x2d3   : > { %vm385_vm0 = vcmp.eq.s32.totalorder %v353_v16, %v310_v7 }
 0x2d4   : > { %vm737_vm1 = vmpackc.low %vm385_vm0, %vm384_vm15 }
 0x2d5   : > { %738 = vmatpush3.bf16.msk.msra.mxu0 %vm737_vm1, %v908_v10 }
 0x2d6   : > { %v356_v17 = vpop.permute.xlu0 %355  ;;  %739 = vmatprep.subr.bf16.mxu0 %v905_v42 }
 0x2d7   : > { %vm386_vm2 = vcmp.eq.s32.totalorder %v356_v17, %v310_v7 }
 0x2da   : > { %v359_v18 = vpop.permute.xlu0 %358 }
 0x2db   : > { %vm387_vm3 = vcmp.eq.s32.totalorder %v359_v18, %v310_v7 }
 0x2dc   : > { %vm740_vm4 = vmpackc.low %vm387_vm3, %vm386_vm2 }
 0x2dd   : > { %741 = vmatpush3.bf16.msk.msra.mxu0 %vm740_vm4, %v908_v10 }
 0x2de   : > { %v362_v19 = vpop.permute.xlu0 %361  ;;  %742 = vmatprep.subr.bf16.mxu0 %v905_v42 }
 0x2df   : > { %vm388_vm5 = vcmp.eq.s32.totalorder %v362_v19, %v310_v7 }
 0x2e2   : > { %v365_v20 = vpop.permute.xlu0 %364 }
 0x2e3   : > { %vm389_vm6 = vcmp.eq.s32.totalorder %v365_v20, %v310_v7 }
 0x2e4   : > { %vm743_vm7 = vmpackc.low %vm389_vm6, %vm388_vm5 }
 0x2e5   : > { %744 = vmatpush3.bf16.msk.msra.mxu0 %vm743_vm7, %v908_v10 }
 0x2e6   : > { %745 = vmatprep.subr.bf16.mxu0 %v905_v42  ;;  %v368_v21 = vpop.permute.xlu0 %367 }
 0x2e7   : > { %vm390_vm8 = vcmp.eq.s32.totalorder %v368_v21, %v310_v7 }
 0x2ea   : > { %v371_v22 = vpop.permute.xlu1 %370 }
 0x2eb   : > { %vm391_vm9 = vcmp.eq.s32.totalorder %v371_v22, %v310_v7 }
 0x2ec   : > { %vm746_vm10 = vmpackc.low %vm391_vm9, %vm390_vm8 }
 0x2ed   : > { %747 = vmatpush3.bf16.msk.msra.mxu0 %vm746_vm10, %v908_v10 }
 0x2ee   : > { %748 = vmatprep.subr.bf16.mxu0 %v905_v42  ;;  %v374_v23 = vpop.permute.xlu0 %373 }
 0x2ef   : > { %vm392_vm11 = vcmp.eq.s32.totalorder %v374_v23, %v310_v7 }
 0x2f2   : > { %v377_v24 = vpop.permute.xlu1 %376 }
 0x2f3   : > { %vm393_vm12 = vcmp.eq.s32.totalorder %v377_v24, %v310_v7 }
 0x2f4   : > { %vm749_vm13 = vmpackc.low %vm393_vm12, %vm392_vm11 }
 0x2f5   : > { %750 = vmatpush3.bf16.msk.msra.mxu0 %vm749_vm13, %v908_v10 }
 0x2f8   : > { %725 = vmatmul.mubr.f32.vlgmr.msra.gmra.mrb[0].mxu0 %v313_v25 }
 0x3cb   : > { %v492_v26 = vpop.f32.mrb[0].mxu0 }
 0x3cc   : > { %v496_v27 = vmax.f32 %v492_v26, 1.0  ;;  %v726_v28 = vpop.f32.mrb[1].mxu0 }
 0x3ce   : > { %822 = vrcp.f32 %v496_v27 }
 0x3d8   : > { %v823_v31 = vpop.eup %822 }
 0x3d9   : > { %v501_v32 = vrot.slane %v823_v31, %v500_v30 }
 0x3db   : > { %v502_v33 = vmul.f32 %v501_v32, %v492_v26 }
 0x3dd   : > { %503 = vst [vmem:[%s189_s23] sm:$0xf] %v502_v33 }
 0x3de   : > { %837 = shalt.err (!%p834_p5)
}
 0x3df   : > { %s838_s7 = scalar_lea.hbm %s1032_s29, 64  ;;  %s842_s10 = scalar_lea.hbm %s1081_s2, 128 }
 0x3e0   : > { %p839_p6 = scmp.ne.s32.totalorder %s1032_s29, %s838_s7  ;;  %p843_p10 = scmp.lt.u32.totalorder %s1032_s29, %s1081_s2 }
 0x3e1   : > { %p844_p11 = scmp.lt.u32.totalorder %s842_s10, %s838_s7  ;;  %p846_p13 = scmp.lt.u32.totalorder %s838_s7, %s1032_s29 }
 0x3e2   : > { %p840_p7 = pnand %p839_p6, %p970_p4 }
 0x3e3   : > { %p845_p12 = por %p844_p11, %p843_p10 }
 0x3e4   : > { %p841_p9 = pneg %p840_p7 }
 0x3e5   : > { %p847_p0 = por %p846_p13, %p845_p12 }
 0x3e7   : > { %p848_p1 = pnand %p847_p0, %p841_p9 }
 0x3e9   : > { %851 = shalt.err (!%p848_p1)
}
 0x3ea   : > { %756 = dma.vmem_to_hbm [thread:$0]  (%p970_p4), %s1034_s26, 64, %s1032_s29, %s505_s30  }
 0x3eb PF: > { %p762_p2 = scmp.ge.s32.totalorder %s902_s17, 2  ;;  %s538_s19 = sand.u32 1, %s882_s12  }
 0x3ec   : > { %s539_s21 = scalar_lea.sflag [#allocation6], %s538_s19 }
 0x3ed   : > { %p759_p3 = pnand %p762_p2, %p977_p8 }
 0x3ef   : > { %877 = dma.done.wait (!%p759_p3), %s539_s21, 64  }
 0x3f0   : > { %879 = vsyncadd (!%p759_p3), %s539_s21, 4294967232  ;;  %s17_s17 = sadd.s32 1, %s902_s17   ;;  %s1085_s12 = smov %s886_s13 }
 0x3f1   : > { %p14_p5 = scmp.ge.s32.totalorder %s17_s17, 4   ;;  %s1086_s13 = smov %s890_s14 }
 0x3f2   : > { %s1087_s14 = smov %s983_s25  ;;  %s1088_s15 = smov %s898_s16 }
 0x3f3   : > { %s1089_s16 = smov %s1091_s20  ;;  %16 = sbr.rel (!%p14_p5) target bundleno = 4 (0x4), region = 82 }
 0x3fa   :  { %551 = vsyncpa [#allocation6], 1 }
 0x3fb   :  { %553 = vsyncpa [#allocation6 + $0x1], 1 }

</bundles_post_ra>
